<compile_context>
chip_gen: v7x
topology: tpu7x:2x2x1
jax: 0.10.0
libtpu: 0.0.40
codegen_flags: <defaults>
</compile_context>

<pallas_src>
import functools
import itertools

import numpy as np
import jax
import jax.numpy as jnp
from jax import lax
from jax.experimental import pallas as pl
from jax.experimental.pallas import tpu as pltpu

M_PAD = 128  # lane-dense padding of the target dimension for the cost matrix

try:
    from scipy.optimize import linear_sum_assignment as _scipy_lsa
except Exception:  # pragma: no cover - scipy normally ships with jax
    _scipy_lsa = None


# --------------------------------------------------------------------------
# Kernel 1 (grid over B, "parallel"): matching cost matrix + log-probs.
#   cost[n, m] = w_ce*(-softmax(cls)[n, cls_gt[m]]) + w_bbox*L1 + w_giou*(-IoU)
# --------------------------------------------------------------------------
def _cost_kernel(cls_ref, bb_ref, ids_ref, tgt_ref, cost_ref, logprob_ref,
                 *, w_ce, w_bbox, w_giou):
    C = cls_ref.shape[2]
    m_pad = ids_ref.shape[-1]

    logits = cls_ref[0].astype(jnp.float32)                     # [N, C]
    mx = jnp.max(logits, axis=-1, keepdims=True)
    e = jnp.exp(logits - mx)
    s = jnp.sum(e, axis=-1, keepdims=True)

    # Exact log-probs, reused by the loss kernel (avoids a second logsumexp pass).
    logprob_ref[0] = logits - mx - jnp.log(s)

    # Softmax denom on the EUP (ranking-only; use exact e/s for bit-faithful
    # matching vs. the PyTorch reference on near-tie costs).
    probs = e * pl.reciprocal(s, approx=True)                   # [N, C]

    # MXU class-prob gather: onehot[C, M_PAD] from iota == ids (pad lanes hold -1).
    ids = ids_ref[0]                                            # [1, M_PAD] int32
    onehot = (lax.broadcasted_iota(jnp.int32, (C, m_pad), 0) == ids).astype(jnp.float32)
    cost_class = -jnp.dot(probs, onehot, preferred_element_type=jnp.float32)  # [N, M_PAD]

    bb = bb_ref[0]                                              # [N, 4]     cxcywh
    tgt = tgt_ref[0]                                            # [4, M_PAD] cxcywh, coord-major

    # L1 cdist on cxcywh coords
    cost_bbox = (jnp.abs(bb[:, 0:1] - tgt[0:1, :]) +
                 jnp.abs(bb[:, 1:2] - tgt[1:2, :]) +
                 jnp.abs(bb[:, 2:3] - tgt[2:3, :]) +
                 jnp.abs(bb[:, 3:4] - tgt[3:4, :]))             # [N, M_PAD]

    # cxcywh -> xyxy, pairwise IoU
    x1o = bb[:, 0:1] - 0.5 * bb[:, 2:3]; x2o = bb[:, 0:1] + 0.5 * bb[:, 2:3]
    y1o = bb[:, 1:2] - 0.5 * bb[:, 3:4]; y2o = bb[:, 1:2] + 0.5 * bb[:, 3:4]
    x1t = tgt[0:1, :] - 0.5 * tgt[2:3, :]; x2t = tgt[0:1, :] + 0.5 * tgt[2:3, :]
    y1t = tgt[1:2, :] - 0.5 * tgt[3:4, :]; y2t = tgt[1:2, :] + 0.5 * tgt[3:4, :]
    area_o = (x2o - x1o) * (y2o - y1o)                          # [N, 1]
    area_t = (x2t - x1t) * (y2t - y1t)                          # [1, M_PAD]
    iw = jnp.maximum(jnp.minimum(x2o, x2t) - jnp.maximum(x1o, x1t), 0.0)
    ih = jnp.maximum(jnp.minimum(y2o, y2t) - jnp.maximum(y1o, y1t), 0.0)
    inter = iw * ih
    iou = inter * pl.reciprocal(area_o + area_t - inter + 1e-7, approx=True)

    cost_ref[0] = w_ce * cost_class + w_bbox * cost_bbox - w_giou * iou


@functools.partial(jax.jit, static_argnames=("w_ce", "w_bbox", "w_giou"))
def _stage1(cls_pred, bb_pred, cls_gt, bb_gt, *, w_ce, w_bbox, w_giou):
    """Device stage 1: pad/transpose GT on device, run the cost kernel."""
    B, N, C = cls_pred.shape
    M = cls_gt.shape[1]

    # Device-side lane padding / coord-major transpose (no host numpy, ids as int32).
    ids_pad = jnp.full((B, 1, M_PAD), -1, jnp.int32).at[:, 0, :M].set(
        cls_gt.astype(jnp.int32))
    tgt_t_pad = jnp.zeros((B, 4, M_PAD), jnp.float32).at[:, :, :M].set(
        jnp.transpose(bb_gt.astype(jnp.float32), (0, 2, 1)))

    kernel = functools.partial(_cost_kernel, w_ce=w_ce, w_bbox=w_bbox, w_giou=w_giou)
    cost_pad, logprob = pl.pallas_call(
        kernel,
        grid=(B,),
        in_specs=[
            pl.BlockSpec((1, N, C), lambda b: (b, 0, 0)),
            pl.BlockSpec((1, N, 4), lambda b: (b, 0, 0)),
            pl.BlockSpec((1, 1, M_PAD), lambda b: (b, 0, 0)),
            pl.BlockSpec((1, 4, M_PAD), lambda b: (b, 0, 0)),
        ],
        out_specs=(
            pl.BlockSpec((1, N, M_PAD), lambda b: (b, 0, 0)),
            pl.BlockSpec((1, N, C), lambda b: (b, 0, 0)),
        ),
        out_shape=(
            jax.ShapeDtypeStruct((B, N, M_PAD), jnp.float32),
            jax.ShapeDtypeStruct((B, N, C), jnp.float32),
        ),
        compiler_params=pltpu.CompilerParams(dimension_semantics=("parallel",)),
    )(cls_pred.astype(jnp.float32), bb_pred.astype(jnp.float32), ids_pad, tgt_t_pad)

    # Slice off the lane padding on device so the readback is only B*N*M floats.
    return cost_pad[:, :, :M], logprob


# --------------------------------------------------------------------------
# Kernel 2 (grid over B, "parallel"): per-batch unweighted (ce, bbox, giou).
#   out[b, 0, 0] = ce, out[b, 0, 1] = bbox, out[b, 0, 2] = giou.
# --------------------------------------------------------------------------
def _loss_kernel(logprob_ref, tcls_ref, src_ref, tgt_ref, tgt_t_ref, out_ref,
                 *, no_obj_weight):
    N, C = logprob_ref.shape[1], logprob_ref.shape[2]
    M = src_ref.shape[1]

    # ---- weighted cross entropy over all N queries --------------------------
    logprob = logprob_ref[0]                                    # [N, C]
    tc = tcls_ref[0]                                            # [N, 1] int32
    onehot = (lax.broadcasted_iota(jnp.int32, (N, C), 1) == tc).astype(jnp.float32)
    nll = -jnp.sum(logprob * onehot, axis=-1, keepdims=True)    # [N, 1]
    # empty_weight = ones except last class = no_obj_weight
    wt = jnp.where(tc == C - 1, no_obj_weight, 1.0)             # [N, 1]
    loss_ce = (jnp.sum(wt * nll, keepdims=True) /
               jnp.sum(wt, keepdims=True))                      # (1, 1)

    # ---- L1 box loss on matched pairs (F.l1_loss: mean over M*4 elements) ---
    src = src_ref[0]                                            # [M, 4] cxcywh
    tgt = tgt_ref[0]                                            # [M, 4] cxcywh
    loss_bbox = jnp.sum(jnp.abs(src - tgt), keepdims=True) / float(M * 4)

    # ---- "giou" loss: (1 - pairwise IoU[M, M]).mean(), as in the reference --
    tgt_t = tgt_t_ref[0]                                        # [4, M]
    x1o = src[:, 0:1] - 0.5 * src[:, 2:3]; x2o = src[:, 0:1] + 0.5 * src[:, 2:3]
    y1o = src[:, 1:2] - 0.5 * src[:, 3:4]; y2o = src[:, 1:2] + 0.5 * src[:, 3:4]
    x1t = tgt_t[0:1, :] - 0.5 * tgt_t[2:3, :]; x2t = tgt_t[0:1, :] + 0.5 * tgt_t[2:3, :]
    y1t = tgt_t[1:2, :] - 0.5 * tgt_t[3:4, :]; y2t = tgt_t[1:2, :] + 0.5 * tgt_t[3:4, :]
    area_o = (x2o - x1o) * (y2o - y1o)                          # [M, 1]
    area_t = (x2t - x1t) * (y2t - y1t)                          # [1, M]
    iw = jnp.maximum(jnp.minimum(x2o, x2t) - jnp.maximum(x1o, x1t), 0.0)
    ih = jnp.maximum(jnp.minimum(y2o, y2t) - jnp.maximum(y1o, y1t), 0.0)
    inter = iw * ih
    iou = inter / (area_o + area_t - inter + 1e-7)              # exact div + NaN guard
    loss_giou = jnp.sum(1.0 - iou, keepdims=True) / float(M * M)

    # Lanes 0..2 of sublane 0 carry the three raw losses (weighting + /B in jnp).
    lane = lax.broadcasted_iota(jnp.int32, (8, 128), 1)
    out_ref[0] = jnp.where(lane == 0, loss_ce,
                 jnp.where(lane == 1, loss_bbox,
                 jnp.where(lane == 2, loss_giou, 0.0)))


@functools.partial(jax.jit, static_argnames=("w_ce", "w_bbox", "w_giou",
                                             "no_obj_weight", "num_classes"))
def _stage2(logprob, bb_pred, cls_gt, bb_gt, pred_idx, tgt_idx,
            *, w_ce, w_bbox, w_giou, no_obj_weight, num_classes):
    """Device stage 2: gather by matched indices on device, run the loss kernel."""
    B, N, C = logprob.shape
    M = cls_gt.shape[1]
    batch = jnp.arange(B)[:, None]

    # Device-side gathers (the only H2D after matching is pred_idx/tgt_idx, B*M int32).
    tgt_cls = cls_gt[batch, tgt_idx].astype(jnp.int32)                    # [B, M]
    target_classes = jnp.full((B, N), num_classes - 1, jnp.int32)
    target_classes = target_classes.at[batch, pred_idx].set(tgt_cls)      # [B, N]
    src_boxes = bb_pred[batch, pred_idx].astype(jnp.float32)              # [B, M, 4]
    tgt_boxes = bb_gt[batch, tgt_idx].astype(jnp.float32)                 # [B, M, 4]
    tgt_boxes_t = jnp.transpose(tgt_boxes, (0, 2, 1))                     # [B, 4, M]

    kernel = functools.partial(_loss_kernel, no_obj_weight=no_obj_weight)
    per_batch = pl.pallas_call(
        kernel,
        grid=(B,),
        in_specs=[
            pl.BlockSpec((1, N, C), lambda b: (b, 0, 0)),
            pl.BlockSpec((1, N, 1), lambda b: (b, 0, 0)),
            pl.BlockSpec((1, M, 4), lambda b: (b, 0, 0)),
            pl.BlockSpec((1, M, 4), lambda b: (b, 0, 0)),
            pl.BlockSpec((1, 4, M), lambda b: (b, 0, 0)),
        ],
        out_specs=pl.BlockSpec((1, 8, 128), lambda b: (b, 0, 0)),
        out_shape=jax.ShapeDtypeStruct((B, 8, 128), jnp.float32),
        compiler_params=pltpu.CompilerParams(dimension_semantics=("parallel",)),
    )(logprob, target_classes[..., None], src_boxes, tgt_boxes, tgt_boxes_t)

    raw = per_batch[:, 0, :3]                                   # [B, 3] unweighted
    weights = jnp.array([w_ce, w_bbox, w_giou], jnp.float32)
    weighted = jnp.mean(raw, axis=0) * weights                  # sum over B, *w, /B
    total = jnp.sum(weighted, keepdims=True)
    return jnp.concatenate([weighted, total])                   # [4]: ce, bbox, giou, total


# --------------------------------------------------------------------------
# Host-side assignment
# --------------------------------------------------------------------------
# TODO(synk): the Hungarian matcher (scipy.optimize.linear_sum_assignment) has no
# Pallas equivalent; it stays on host between the two device stages.
def _lsa_bruteforce(C):
    N, M = C.shape
    best_cost, best_perm = None, None
    for perm in itertools.permutations(range(N), M):
        c = sum(C[perm[j], j] for j in range(M))
        if best_cost is None or c < best_cost:
            best_cost, best_perm = c, perm
    return np.asarray(best_perm, np.int32), np.arange(M, dtype=np.int32)


def _solve_assignment(C):
    if _scipy_lsa is not None:
        r, c = _scipy_lsa(C)
        return np.asarray(r, np.int32), np.asarray(c, np.int32)
    return _lsa_bruteforce(C)   # tiny-shape fallback only


# --------------------------------------------------------------------------
# Full BipartiteLoss forward
# --------------------------------------------------------------------------
def bipartite_loss(cls_pred, bb_pred, cls_gt, bb_gt, weight_dict,
                   num_classes, no_obj_weight=0.1):
    B, N, C = cls_pred.shape
    M = cls_gt.shape[1]
    assert M <= M_PAD
    w_ce = float(weight_dict['ce'])
    w_bbox = float(weight_dict['bbox'])
    w_giou = float(weight_dict['giou'])

    # --- stage 1: cost matrices + log-probs on device (Pallas kernel 1) ---
    cost, logprob = _stage1(cls_pred, bb_pred, cls_gt, bb_gt,
                            w_ce=w_ce, w_bbox=w_bbox, w_giou=w_giou)
    cost_np = np.asarray(jax.device_get(cost))      # only D2H: B*N*M floats

    # --- host Hungarian matching ---
    pred_idx = np.zeros((B, M), np.int32)
    tgt_idx = np.zeros((B, M), np.int32)
    for b in range(B):
        pi, ti = _solve_assignment(cost_np[b])
        pred_idx[b], tgt_idx[b] = pi, ti

    # --- stage 2: device gathers + fused losses (Pallas kernel 2) ---
    out = _stage2(logprob, bb_pred, cls_gt, bb_gt,
                  jnp.asarray(pred_idx, jnp.int32), jnp.asarray(tgt_idx, jnp.int32),
                  w_ce=w_ce, w_bbox=w_bbox, w_giou=w_giou,
                  no_obj_weight=float(no_obj_weight), num_classes=int(num_classes))
    res = np.asarray(jax.block_until_ready(out))

    return {
        'loss_ce': float(res[0]),
        'loss_bbox': float(res[1]),
        'loss_giou': float(res[2]),
        'total': float(res[3]),
    }


if __name__ == "__main__":
    # Small shapes consistent with the module: B=2, num_queries N=8,
    # num_classes C=16 (last class = no-object), M=4 GT boxes per image.
    B, N, M, C = 2, 8, 4, 16
    weight_dict = {'ce': 1.0, 'bbox': 5.0, 'giou': 2.0}
    no_obj_weight = 0.1

    key = jax.random.PRNGKey(0)
    k1, k2, k3, k4 = jax.random.split(key, 4)
    cls_pred = jax.random.normal(k1, (B, N, C), dtype=jnp.float32)
    bb_pred = jax.nn.sigmoid(jax.random.normal(k2, (B, N, 4), dtype=jnp.float32))
    cls_gt = jax.random.randint(k3, (B, M), 0, C - 1)      # real classes in [0, C-2]
    bb_gt = jax.nn.sigmoid(jax.random.normal(k4, (B, M, 4), dtype=jnp.float32))

    losses = bipartite_loss(cls_pred, bb_pred, cls_gt, bb_gt,
                            weight_dict, num_classes=C, no_obj_weight=no_obj_weight)
    assert all(np.isfinite(v) for v in losses.values())
    print("KERNEL_OK")
</pallas_src>

<mosaic_0001>
module attributes {stable_mosaic.version = 11 : i64} {
  func.func @_cost_kernel(%arg0: i32, %arg1: memref<1x8x16xf32, #tpu.memory_space<vmem>>, %arg2: memref<1x8x4xf32, #tpu.memory_space<vmem>>, %arg3: memref<1x1x128xi32, #tpu.memory_space<vmem>>, %arg4: memref<1x4x128xf32, #tpu.memory_space<vmem>>, %arg5: memref<1x8x128xf32, #tpu.memory_space<vmem>>, %arg6: memref<1x8x16xf32, #tpu.memory_space<vmem>>) attributes {dimension_semantics = [#tpu.dimension_semantics<parallel>], iteration_bounds = array<i64: 2>, scalar_prefetch = 0 : i64, scratch_operands = 0 : i64, tpu.core_type = #tpu.core_type<tc>, window_params = [{transform_indices = @transform_0, window_bounds = array<i64: 1, 8, 16>}, {transform_indices = @transform_1, window_bounds = array<i64: 1, 8, 4>}, {transform_indices = @transform_2, window_bounds = array<i64: 1, 1, 128>}, {transform_indices = @transform_3, window_bounds = array<i64: 1, 4, 128>}, {transform_indices = @transform_4, window_bounds = array<i64: 1, 8, 128>}, {transform_indices = @transform_5, window_bounds = array<i64: 1, 8, 16>}]} {
    %c0 = arith.constant 0 : index
    %c0_0 = arith.constant 0 : index
    %c0_1 = arith.constant 0 : index
    %0 = vector.load %arg1[%c0, %c0_0, %c0_1] : memref<1x8x16xf32, #tpu.memory_space<vmem>>, vector<1x8x16xf32>
    %1 = vector.shape_cast %0 : vector<1x8x16xf32> to vector<8x16xf32>
    %cst = arith.constant dense<0xFF800000> : vector<8xf32>
    %2 = vector.multi_reduction <maximumf>, %1, %cst [1] : vector<8x16xf32> to vector<8xf32>
    %3 = vector.shape_cast %2 : vector<8xf32> to vector<8x1xf32>
    %4 = vector.broadcast %3 : vector<8x1xf32> to vector<8x16xf32>
    %5 = arith.subf %1, %4 : vector<8x16xf32>
    %6 = math.exp %5 : vector<8x16xf32>
    %cst_2 = arith.constant dense<0.000000e+00> : vector<8xf32>
    %7 = vector.multi_reduction <add>, %6, %cst_2 [1] : vector<8x16xf32> to vector<8xf32>
    %8 = vector.shape_cast %7 : vector<8xf32> to vector<8x1xf32>
    %9 = vector.broadcast %3 : vector<8x1xf32> to vector<8x16xf32>
    %10 = arith.subf %1, %9 : vector<8x16xf32>
    %11 = math.log %8 : vector<8x1xf32>
    %12 = vector.broadcast %11 : vector<8x1xf32> to vector<8x16xf32>
    %13 = arith.subf %10, %12 : vector<8x16xf32>
    %c0_3 = arith.constant 0 : index
    %c0_4 = arith.constant 0 : index
    %c0_5 = arith.constant 0 : index
    %14 = vector.load %arg6[%c0_3, %c0_4, %c0_5] : memref<1x8x16xf32, #tpu.memory_space<vmem>>, vector<1x8x16xf32>
    %15 = vector.shape_cast %14 : vector<1x8x16xf32> to vector<8x16xf32>
    %16 = vector.shape_cast %13 : vector<8x16xf32> to vector<1x8x16xf32>
    tpu.vector_store %arg6[%c0_3, %c0_4, %c0_5], %16 {strides = array<i32>} : memref<1x8x16xf32, #tpu.memory_space<vmem>>, vector<1x8x16xf32>,
    %17 = tpu.reciprocal %8 {approx = true} : vector<8x1xf32> -> vector<8x1xf32>
    %18 = vector.broadcast %17 : vector<8x1xf32> to vector<8x16xf32>
    %19 = arith.mulf %6, %18 : vector<8x16xf32>
    %c0_6 = arith.constant 0 : index
    %c0_7 = arith.constant 0 : index
    %c0_8 = arith.constant 0 : index
    %20 = vector.load %arg3[%c0_6, %c0_7, %c0_8] : memref<1x1x128xi32, #tpu.memory_space<vmem>>, vector<1x1x128xi32>
    %21 = vector.shape_cast %20 : vector<1x1x128xi32> to vector<1x128xi32>
    %22 = tpu.iota {dimensions = array<i32: 0>} : vector<16x128xi32>
    %23 = vector.broadcast %21 : vector<1x128xi32> to vector<16x128xi32>
    %24 = arith.cmpi eq, %22, %23 : vector<16x128xi32>
    %25 = arith.extui %24 : vector<16x128xi1> to vector<16x128xi32>
    %26 = arith.sitofp %25 : vector<16x128xi32> to vector<16x128xf32>
    %cst_9 = arith.constant dense<0.000000e+00> : vector<8x128xf32>
    %27 = tpu.matmul %19, %26, %cst_9 {dimension_numbers = #tpu.dot_dimension_numbers<[1], [0], [0], [1], [0, 0, 1, 1], [], []>} : vector<8x16xf32>, vector<16x128xf32>, vector<8x128xf32> -> vector<8x128xf32>
    %cst_10 = arith.constant 0.000000e+00 : f32
    %28 = vector.broadcast %cst_10 : f32 to vector<8x128xf32>
    %29 = arith.subf %28, %27 : vector<8x128xf32>
    %c0_11 = arith.constant 0 : index
    %c0_12 = arith.constant 0 : index
    %c0_13 = arith.constant 0 : index
    %30 = vector.load %arg2[%c0_11, %c0_12, %c0_13] : memref<1x8x4xf32, #tpu.memory_space<vmem>>, vector<1x8x4xf32>
    %31 = vector.shape_cast %30 : vector<1x8x4xf32> to vector<8x4xf32>
    %c0_14 = arith.constant 0 : index
    %c0_15 = arith.constant 0 : index
    %c0_16 = arith.constant 0 : index
    %32 = vector.load %arg4[%c0_14, %c0_15, %c0_16] : memref<1x4x128xf32, #tpu.memory_space<vmem>>, vector<1x4x128xf32>
    %33 = vector.shape_cast %32 : vector<1x4x128xf32> to vector<4x128xf32>
    %34 = vector.extract_strided_slice %31 {offsets = [0, 0], sizes = [8, 1], strides = [1, 1]} : vector<8x4xf32> to vector<8x1xf32>
    %35 = vector.extract_strided_slice %33 {offsets = [0, 0], sizes = [1, 128], strides = [1, 1]} : vector<4x128xf32> to vector<1x128xf32>
    %36 = vector.broadcast %34 : vector<8x1xf32> to vector<8x128xf32>
    %37 = vector.broadcast %35 : vector<1x128xf32> to vector<8x128xf32>
    %38 = arith.subf %36, %37 : vector<8x128xf32>
    %39 = math.absf %38 : vector<8x128xf32>
    %40 = vector.extract_strided_slice %31 {offsets = [0, 1], sizes = [8, 1], strides = [1, 1]} : vector<8x4xf32> to vector<8x1xf32>
    %41 = vector.extract_strided_slice %33 {offsets = [1, 0], sizes = [1, 128], strides = [1, 1]} : vector<4x128xf32> to vector<1x128xf32>
    %42 = vector.broadcast %40 : vector<8x1xf32> to vector<8x128xf32>
    %43 = vector.broadcast %41 : vector<1x128xf32> to vector<8x128xf32>
    %44 = arith.subf %42, %43 : vector<8x128xf32>
    %45 = math.absf %44 : vector<8x128xf32>
    %46 = arith.addf %39, %45 : vector<8x128xf32>
    %47 = vector.extract_strided_slice %31 {offsets = [0, 2], sizes = [8, 1], strides = [1, 1]} : vector<8x4xf32> to vector<8x1xf32>
    %48 = vector.extract_strided_slice %33 {offsets = [2, 0], sizes = [1, 128], strides = [1, 1]} : vector<4x128xf32> to vector<1x128xf32>
    %49 = vector.broadcast %47 : vector<8x1xf32> to vector<8x128xf32>
    %50 = vector.broadcast %48 : vector<1x128xf32> to vector<8x128xf32>
    %51 = arith.subf %49, %50 : vector<8x128xf32>
    %52 = math.absf %51 : vector<8x128xf32>
    %53 = arith.addf %46, %52 : vector<8x128xf32>
    %54 = vector.extract_strided_slice %31 {offsets = [0, 3], sizes = [8, 1], strides = [1, 1]} : vector<8x4xf32> to vector<8x1xf32>
    %55 = vector.extract_strided_slice %33 {offsets = [3, 0], sizes = [1, 128], strides = [1, 1]} : vector<4x128xf32> to vector<1x128xf32>
    %56 = vector.broadcast %54 : vector<8x1xf32> to vector<8x128xf32>
    %57 = vector.broadcast %55 : vector<1x128xf32> to vector<8x128xf32>
    %58 = arith.subf %56, %57 : vector<8x128xf32>
    %59 = math.absf %58 : vector<8x128xf32>
    %60 = arith.addf %53, %59 : vector<8x128xf32>
    %61 = vector.extract_strided_slice %31 {offsets = [0, 0], sizes = [8, 1], strides = [1, 1]} : vector<8x4xf32> to vector<8x1xf32>
    %62 = vector.extract_strided_slice %31 {offsets = [0, 2], sizes = [8, 1], strides = [1, 1]} : vector<8x4xf32> to vector<8x1xf32>
    %cst_17 = arith.constant 5.000000e-01 : f32
    %63 = vector.broadcast %cst_17 : f32 to vector<8x1xf32>
    %64 = arith.mulf %63, %62 : vector<8x1xf32>
    %65 = arith.subf %61, %64 : vector<8x1xf32>
    %66 = vector.extract_strided_slice %31 {offsets = [0, 0], sizes = [8, 1], strides = [1, 1]} : vector<8x4xf32> to vector<8x1xf32>
    %67 = vector.extract_strided_slice %31 {offsets = [0, 2], sizes = [8, 1], strides = [1, 1]} : vector<8x4xf32> to vector<8x1xf32>
    %cst_18 = arith.constant 5.000000e-01 : f32
    %68 = vector.broadcast %cst_18 : f32 to vector<8x1xf32>
    %69 = arith.mulf %68, %67 : vector<8x1xf32>
    %70 = arith.addf %66, %69 : vector<8x1xf32>
    %71 = vector.extract_strided_slice %31 {offsets = [0, 1], sizes = [8, 1], strides = [1, 1]} : vector<8x4xf32> to vector<8x1xf32>
    %72 = vector.extract_strided_slice %31 {offsets = [0, 3], sizes = [8, 1], strides = [1, 1]} : vector<8x4xf32> to vector<8x1xf32>
    %cst_19 = arith.constant 5.000000e-01 : f32
    %73 = vector.broadcast %cst_19 : f32 to vector<8x1xf32>
    %74 = arith.mulf %73, %72 : vector<8x1xf32>
    %75 = arith.subf %71, %74 : vector<8x1xf32>
    %76 = vector.extract_strided_slice %31 {offsets = [0, 1], sizes = [8, 1], strides = [1, 1]} : vector<8x4xf32> to vector<8x1xf32>
    %77 = vector.extract_strided_slice %31 {offsets = [0, 3], sizes = [8, 1], strides = [1, 1]} : vector<8x4xf32> to vector<8x1xf32>
    %cst_20 = arith.constant 5.000000e-01 : f32
    %78 = vector.broadcast %cst_20 : f32 to vector<8x1xf32>
    %79 = arith.mulf %78, %77 : vector<8x1xf32>
    %80 = arith.addf %76, %79 : vector<8x1xf32>
    %81 = vector.extract_strided_slice %33 {offsets = [0, 0], sizes = [1, 128], strides = [1, 1]} : vector<4x128xf32> to vector<1x128xf32>
    %82 = vector.extract_strided_slice %33 {offsets = [2, 0], sizes = [1, 128], strides = [1, 1]} : vector<4x128xf32> to vector<1x128xf32>
    %cst_21 = arith.constant 5.000000e-01 : f32
    %83 = vector.broadcast %cst_21 : f32 to vector<1x128xf32>
    %84 = arith.mulf %83, %82 : vector<1x128xf32>
    %85 = arith.subf %81, %84 : vector<1x128xf32>
    %86 = vector.extract_strided_slice %33 {offsets = [0, 0], sizes = [1, 128], strides = [1, 1]} : vector<4x128xf32> to vector<1x128xf32>
    %87 = vector.extract_strided_slice %33 {offsets = [2, 0], sizes = [1, 128], strides = [1, 1]} : vector<4x128xf32> to vector<1x128xf32>
    %cst_22 = arith.constant 5.000000e-01 : f32
    %88 = vector.broadcast %cst_22 : f32 to vector<1x128xf32>
    %89 = arith.mulf %88, %87 : vector<1x128xf32>
    %90 = arith.addf %86, %89 : vector<1x128xf32>
    %91 = vector.extract_strided_slice %33 {offsets = [1, 0], sizes = [1, 128], strides = [1, 1]} : vector<4x128xf32> to vector<1x128xf32>
    %92 = vector.extract_strided_slice %33 {offsets = [3, 0], sizes = [1, 128], strides = [1, 1]} : vector<4x128xf32> to vector<1x128xf32>
    %cst_23 = arith.constant 5.000000e-01 : f32
    %93 = vector.broadcast %cst_23 : f32 to vector<1x128xf32>
    %94 = arith.mulf %93, %92 : vector<1x128xf32>
    %95 = arith.subf %91, %94 : vector<1x128xf32>
    %96 = vector.extract_strided_slice %33 {offsets = [1, 0], sizes = [1, 128], strides = [1, 1]} : vector<4x128xf32> to vector<1x128xf32>
    %97 = vector.extract_strided_slice %33 {offsets = [3, 0], sizes = [1, 128], strides = [1, 1]} : vector<4x128xf32> to vector<1x128xf32>
    %cst_24 = arith.constant 5.000000e-01 : f32
    %98 = vector.broadcast %cst_24 : f32 to vector<1x128xf32>
    %99 = arith.mulf %98, %97 : vector<1x128xf32>
    %100 = arith.addf %96, %99 : vector<1x128xf32>
    %101 = arith.subf %70, %65 : vector<8x1xf32>
    %102 = arith.subf %80, %75 : vector<8x1xf32>
    %103 = arith.mulf %101, %102 : vector<8x1xf32>
    %104 = arith.subf %90, %85 : vector<1x128xf32>
    %105 = arith.subf %100, %95 : vector<1x128xf32>
    %106 = arith.mulf %104, %105 : vector<1x128xf32>
    %107 = vector.broadcast %70 : vector<8x1xf32> to vector<8x128xf32>
    %108 = vector.broadcast %90 : vector<1x128xf32> to vector<8x128xf32>
    %109 = arith.minimumf %107, %108 : vector<8x128xf32>
    %110 = vector.broadcast %65 : vector<8x1xf32> to vector<8x128xf32>
    %111 = vector.broadcast %85 : vector<1x128xf32> to vector<8x128xf32>
    %112 = arith.maximumf %110, %111 : vector<8x128xf32>
    %113 = arith.subf %109, %112 : vector<8x128xf32>
    %cst_25 = arith.constant 0.000000e+00 : f32
    %114 = vector.broadcast %cst_25 : f32 to vector<8x128xf32>
    %115 = arith.maximumf %113, %114 : vector<8x128xf32>
    %116 = vector.broadcast %80 : vector<8x1xf32> to vector<8x128xf32>
    %117 = vector.broadcast %100 : vector<1x128xf32> to vector<8x128xf32>
    %118 = arith.minimumf %116, %117 : vector<8x128xf32>
    %119 = vector.broadcast %75 : vector<8x1xf32> to vector<8x128xf32>
    %120 = vector.broadcast %95 : vector<1x128xf32> to vector<8x128xf32>
    %121 = arith.maximumf %119, %120 : vector<8x128xf32>
    %122 = arith.subf %118, %121 : vector<8x128xf32>
    %cst_26 = arith.constant 0.000000e+00 : f32
    %123 = vector.broadcast %cst_26 : f32 to vector<8x128xf32>
    %124 = arith.maximumf %122, %123 : vector<8x128xf32>
    %125 = arith.mulf %115, %124 : vector<8x128xf32>
    %126 = vector.broadcast %103 : vector<8x1xf32> to vector<8x128xf32>
    %127 = vector.broadcast %106 : vector<1x128xf32> to vector<8x128xf32>
    %128 = arith.addf %126, %127 : vector<8x128xf32>
    %129 = arith.subf %128, %125 : vector<8x128xf32>
    %cst_27 = arith.constant 1.000000e-07 : f32
    %130 = vector.broadcast %cst_27 : f32 to vector<8x128xf32>
    %131 = arith.addf %129, %130 : vector<8x128xf32>
    %132 = tpu.reciprocal %131 {approx = true} : vector<8x128xf32> -> vector<8x128xf32>
    %133 = arith.mulf %125, %132 : vector<8x128xf32>
    %cst_28 = arith.constant 1.000000e+00 : f32
    %134 = vector.broadcast %cst_28 : f32 to vector<8x128xf32>
    %135 = arith.mulf %134, %29 : vector<8x128xf32>
    %cst_29 = arith.constant 5.000000e+00 : f32
    %136 = vector.broadcast %cst_29 : f32 to vector<8x128xf32>
    %137 = arith.mulf %136, %60 : vector<8x128xf32>
    %138 = arith.addf %135, %137 : vector<8x128xf32>
    %cst_30 = arith.constant 2.000000e+00 : f32
    %139 = vector.broadcast %cst_30 : f32 to vector<8x128xf32>
    %140 = arith.mulf %139, %133 : vector<8x128xf32>
    %141 = arith.subf %138, %140 : vector<8x128xf32>
    %c0_31 = arith.constant 0 : index
    %c0_32 = arith.constant 0 : index
    %c0_33 = arith.constant 0 : index
    %142 = vector.load %arg5[%c0_31, %c0_32, %c0_33] : memref<1x8x128xf32, #tpu.memory_space<vmem>>, vector<1x8x128xf32>
    %143 = vector.shape_cast %142 : vector<1x8x128xf32> to vector<8x128xf32>
    %144 = vector.shape_cast %141 : vector<8x128xf32> to vector<1x8x128xf32>
    tpu.vector_store %arg5[%c0_31, %c0_32, %c0_33], %144 {strides = array<i32>} : memref<1x8x128xf32, #tpu.memory_space<vmem>>, vector<1x8x128xf32>,
    return
  }
  func.func @transform_0(%arg0: i32) -> (i32, i32, i32) {
    %c0_i32 = arith.constant 0 : i32
    %c0_i32_0 = arith.constant 0 : i32
    %c0_i32_1 = arith.constant 0 : i32
    return %arg0, %c0_i32, %c0_i32_0 : i32, i32, i32
  }
  func.func @transform_1(%arg0: i32) -> (i32, i32, i32) {
    %c0_i32 = arith.constant 0 : i32
    %c0_i32_0 = arith.constant 0 : i32
    %c0_i32_1 = arith.constant 0 : i32
    return %arg0, %c0_i32, %c0_i32_0 : i32, i32, i32
  }
  func.func @transform_2(%arg0: i32) -> (i32, i32, i32) {
    %c0_i32 = arith.constant 0 : i32
    %c0_i32_0 = arith.constant 0 : i32
    %c0_i32_1 = arith.constant 0 : i32
    return %arg0, %c0_i32, %c0_i32_0 : i32, i32, i32
  }
  func.func @transform_3(%arg0: i32) -> (i32, i32, i32) {
    %c0_i32 = arith.constant 0 : i32
    %c0_i32_0 = arith.constant 0 : i32
    %c0_i32_1 = arith.constant 0 : i32
    return %arg0, %c0_i32, %c0_i32_0 : i32, i32, i32
  }
  func.func @transform_4(%arg0: i32) -> (i32, i32, i32) {
    %c0_i32 = arith.constant 0 : i32
    %c0_i32_0 = arith.constant 0 : i32
    %c0_i32_1 = arith.constant 0 : i32
    return %arg0, %c0_i32, %c0_i32_0 : i32, i32, i32
  }
  func.func @transform_5(%arg0: i32) -> (i32, i32, i32) {
    %c0_i32 = arith.constant 0 : i32
    %c0_i32_0 = arith.constant 0 : i32
    %c0_i32_1 = arith.constant 0 : i32
    return %arg0, %c0_i32, %c0_i32_0 : i32, i32, i32
  }
}

</mosaic_0001>

<bundles_post_ra>
// kernel: _stage1.1
= control target key start
LH: loop header
LB: loop body
LE: loop exit
PB: predicated region body
PF: predicated region fallthrough
CT: control target
= control target key end

     0   :  { %11 = vsyncpa [#allocation3], 0  ;;  %s982_s0 = inlined_call_operand.vmem [shape: f32[2,8,16], index: 0, kind: input, shape index: {}]   ;;  %s983_s1 = inlined_call_operand.vmem [shape: f32[2,8,4], index: 1, kind: input, shape index: {}]   ;;  %s984_s2 = inlined_call_operand.vmem [shape: s32[2,1,128], index: 2, kind: input, shape index: {}]   ;;  %s985_s3 = inlined_call_operand.vmem [shape: f32[2,4,128], index: 3, kind: input, shape index: {}]   ;;  %s986_s4 = inlined_call_operand.vmem [shape: f32[2,8,128], index: 4, kind: output, shape index: {0}]   ;;  %s987_s5 = inlined_call_operand.hbm [shape: f32[2,8,16], index: 5, kind: output, shape index: {1}]  }
   0x1   :  { %13 = vsyncpa [#allocation3 + $0x1], 0  ;;  %s854_s18 = smov 0   ;;  %s856_s19 = smov 0  }
   0x2   :  { %s858_s20 = smov 0   ;;  %s860_s21 = smov 0  }
   0x3 LB: > { %s875_s22 = sadd.s32 4294967295, %s811_s21   ;;  %s653_s23 = sadd.s32 4294967294, %s811_s21   ;;  %s811_s21 = sphi %s860_s21, %s993_s21   ;;  %s807_s20 = sphi %s858_s20, %s992_s20   ;;  %s803_s19 = sphi %s856_s19, %s991_s19   ;;  %s799_s18 = sphi %s854_s18, %s990_s18  }
   0x4   : > { %s879_s24 = sadd.s32 1, %s811_s21   ;;  %s156_s25 = sadd.s32 1, %s807_s20 }
   0x5   : > { %s153_s26 = ssub.s32 %s811_s21, %s879_s24  ;;  %p166_p0 = scmp.ne.s32.totalorder %s807_s20, %s803_s19 }
   0x6   : > { %p154_p1 = scmp.eq.s32.totalorder %s153_s26, 0  ;;  %p167_p2 = scmp.eq.s32.totalorder %s875_s22, 1 }
   0x7   : > { %p172_p3 = scmp.ne.s32.totalorder %s803_s19, %s799_s18  ;;  %p173_p4 = scmp.eq.s32.totalorder %s653_s23, 1 }
   0x8   : > { %s890_s27 = scalar_select %p154_p1, %s807_s20, %s156_s25  }
   0x9   : > { %p892_p5 = por %p167_p2, %p166_p0  ;;  %p896_p6 = por %p173_p4, %p172_p3 }
   0xa   : > { %p656_p7 = scmp.ge.s32.totalorder %s811_s21, 1  ;;  %p218_p8 = scmp.lt.s32.totalorder %s811_s21, 3 }
   0xc   : > { %p219_p9 = pnand %p656_p7, %p218_p8 }
   0xd   : > { %p260_p10 = scmp.lt.s32.totalorder (!%p219_p9), %s875_s22, 1  ;;  %vm280_vm0 = vcmask (!%p219_p9), 130048   ;;  %s813_s13 = smov (!%p219_p9), 126   ;;  %v814_v4 = vmov (!%p219_p9), 0   ;;  %v816_v9 = vmov (!%p219_p9), 1   ;;  %v297_v15 = vlaneseq (!%p219_p9) }
   0xe   : > { %222 = sbr.rel (%p219_p9) target bundleno = 560 (0x230), region = 36  ;;  %735 = vset.pattern.permute.xlu1 (!%p219_p9), %v814_v4  ;;  %734 = vset.pattern.permute.xlu0 (!%p219_p9), %v814_v4  ;;  %s815_s14 = smov (!%p219_p9), 127   ;;  %v817_v19 = vmov (!%p219_p9), 0.0|0.0   ;;  %v818_v20 = vmov (!%p219_p9), 1.0|1.0   ;;  %vm819_vm4 = vmmov (!%p219_p9), 0  }
   0xf   : > { %v919_v16 = vshrl.u32 (!%p219_p9), %v297_v15, 7  ;;  %682 = vmatprep.subr.bf16.mxu0 (!%p219_p9), %v817_v19  ;;  %v820_v21 = vmov (!%p219_p9), 0.0   ;;  %v821_v24 = vmov (!%p219_p9), 2   ;;  %v822_v25 = vmov (!%p219_p9), 3   ;;  %s257_s23 = sand.u32 (!%p219_p9), 1, %s803_s19   ;;  %s669_s7 = sshll.u32 (!%p219_p9), %s875_s22, 7 }
  0x10   : > { %679 = vmatprep.mubr.msk.f32.mxu0 (!%p219_p9), %vm819_vm4, %v820_v21  ;;  %s657_s25 = sshll.u32 (!%p219_p9), %s257_s23, 3  ;;  %s934_s11 = scalar_lea.hbm (!%p219_p9), %s987_s5, %s669_s7 }
  0x11   : > { %v299_v17 = vadd.s32 (!%p219_p9), 8, %v919_v16  ;;  %s259_s26 = scalar_lea.vmem (!%p219_p9), [#allocation2], %s657_s25 }
  0x12   : > { %s537_s8 = sshll.u32 (!%p219_p9), %s259_s26, 4  ;;  %s538_s8 = int_to_ptr.vmem [resolvable:$true] %s537_s8 }
  0x15   : > { %s904_s30 = scalar_select %p260_p10, %s875_s22, 1 }
  0x17   : > { %s907_s6 = sshll.u32 %s904_s30, 3  ;;  %s270_s17 = scalar_lea.vmem %s984_s2, %s904_s30 }
  0x18   : > { %s263_s9 = scalar_lea.vmem %s982_s0, %s907_s6  ;;  %s267_s12 = scalar_lea.vmem %s983_s1, %s907_s6  ;;  %v662_v18 = vld [vmem:[%s270_s17] ss:$0 sm:$0xff] }
  0x19   : > { %v279_v0 = vld [vmem:[%s263_s9] sm:$0xff]  ;;  %vm304_vm1 = vcmp.eq.s32.totalorder %v919_v16, %v662_v18  ;;  %vm305_vm2 = vcmp.eq.s32.totalorder %v299_v17, %v662_v18 }
  0x1a   : > { %v384_v1 = vld [vmem:[%s267_s12] sm:$0xff]  ;;  %v281_v2 = vsel %vm280_vm0, %v279_v0, -inf  ;;  %vm683_vm3 = vmpackc.low %vm305_vm2, %vm304_vm1  ;;  %s521_s12 = scalar_lea.sflag [#allocation3], %s257_s23 }
  0x1b   : > { %v430_v3 = vmul.f32 0.5, %v384_v1  ;;  %282 = vmax.xlane.f32.xlu0 %v281_v2  ;;  %684 = vmatpush3.bf16.msk.msra.mxu0 %vm683_vm3, %v818_v20 }
  0x1d   : > { %432 = vrot.lane.b32.xlu1 %v430_v3, %s813_s13  ;;  %s749_s13 = scalar_lea.vmem %s538_s8, 128 }
  0x1e   : > { %p750_p11 = scmp.ne.s32.totalorder %s538_s8, %s749_s13 }
  0x20   : > { %p751_p12 = pnand %p750_p11, %p892_p5 }
  0x22   : > { %p752_p13 = pneg %p751_p12 }
  0x8f   : > { %v433_v5 = vpop.permute.xlu1 %432 }
  0x90   : > { %v435_v6 = vsub.f32 %v384_v1, %v433_v5  ;;  %v436_v7 = vadd.f32 %v433_v5, %v384_v1 }
  0x92   : > { %v443_v8 = vsub.f32 %v436_v7, %v435_v6 }
  0x94   : > { %445 = vrot.lane.b32.xlu1 %v443_v8, %s815_s14  ;;  %s823_s14 = smov [#allocation2]  }
  0x95   : > { %s753_s15 = sshll.u32 %s823_s14, 4  ;;  %s754_s15 = int_to_ptr.vmem [resolvable:$false] %s753_s15 }
  0x96   : > { %s755_s16 = scalar_lea.vmem %s754_s15, 256  ;;  %p756_p0 = scmp.lt.s32.totalorder %s538_s8, %s754_s15 }
  0x97   : > { %p757_p1 = scmp.lt.s32.totalorder %s755_s16, %s749_s13 }
  0x98   : > { %466 = vperm.xlu1 %735, %v435_v6  }
  0x99   : > { %p758_p2 = por %p757_p1, %p756_p0 }
  0x9b   : > { %p759_p3 = pnand %p758_p2, %p752_p13 }
  0x9c   : > { %736 = vset.pattern.permute.xlu1 %v816_v9 }
  0x9d   : > { %477 = vperm.xlu1 %736, %v436_v7  }
  0xa1   : > { %486 = vperm.xlu1 %736, %v435_v6  }
  0xa5   : > { %737 = vset.pattern.permute.xlu1 %v814_v4 }
  0xa6   : > { %388 = vperm.xlu1 %737, %v384_v1  }
  0xa8   : > { %v283_v10 = vpop.xlane.xlu0 %282 }
  0xa9   : > { %v284_v11 = vsub.f32 %v279_v0, %v283_v10 }
  0xab   : > { %v285_v12 = vmul.f32 1.442695, %v284_v11 }
  0xad   : > { %741 = vpow2.f32 %v285_v12 }
  0xb7   : > { %v742_v13 = vpop.eup %741 }
  0xb8   : > { %v287_v14 = vsel %vm280_vm0, %v742_v13, 0.0 }
  0xb9   : > { %288 = vadd.xlane.f32.xlu0 %v287_v14 }
  0xcf   : > { %456 = vperm.xlu0 %734, %v436_v7  }
 0x106   : > { %v446_v22 = vpop.permute.xlu1 %445 }
 0x107   : > { %v448_v23 = vmul.f32 %v446_v22, %v443_v8 }
 0x109   : > { %499 = vperm.xlu1 %737, %v448_v23  }
 0x10d   : > { %738 = vset.pattern.permute.xlu1 %v816_v9 }
 0x10e   : > { %398 = vperm.xlu1 %738, %v384_v1  }
 0x112   : > { %739 = vset.pattern.permute.xlu1 %v821_v24 }
 0x113   : > { %409 = vperm.xlu1 %739, %v384_v1  }
 0x117   : > { %740 = vset.pattern.permute.xlu1 %v822_v25 }
 0x118   : > { %420 = vperm.xlu1 %740, %v384_v1  }
 0x146   : > { %v289_v26 = vpop.xlane.xlu0 %288 }
 0x147   : > { %743 = vlog2.f32 %v289_v26 }
 0x148   : > { %745 = vrcp.f32 %v289_v26 }
 0x151   : > { %v744_v27 = vpop.eup %743 }
 0x152   : > { %v746_v28 = vpop.eup %745  ;;  %v291_v29 = vmul.f32 0.6931472, %v744_v27 }
 0x153   : > { %v295_v30 = vmul.f32 %v746_v28, %v742_v13 }
 0x154   : > { %v292_v31 = vsub.f32 %v284_v11, %v291_v29 }
 0x155   : > { %680 = vmatmul.mubr.msk.f32.vlgmr.msra.gmra.mrb[0].mxu0 %vm280_vm0, %v295_v30 }
 0x156   : > { %293 = vst.msk [vmem:[%s259_s26] sm:$0xff] %vm280_vm0, %v292_v31 }
 0x157   : > { %762 = shalt.err (!%p759_p3)
}
 0x158   : > { %s763_s22 = scalar_lea.hbm %s934_s11, 128  ;;  %s767_s25 = scalar_lea.hbm %s987_s5, 256 }
 0x159   : > { %p764_p4 = scmp.ne.s32.totalorder %s934_s11, %s763_s22  ;;  %p768_p9 = scmp.lt.u32.totalorder %s934_s11, %s987_s5 }
 0x15a   : > { %p769_p10 = scmp.lt.u32.totalorder %s767_s25, %s763_s22  ;;  %p771_p12 = scmp.lt.u32.totalorder %s763_s22, %s934_s11 }
 0x15b   : > { %p765_p7 = pnand %p764_p4, %p892_p5 }
 0x15c   : > { %p770_p11 = por %p769_p10, %p768_p9 }
 0x15d   : > { %p766_p8 = pneg %p765_p7 }
 0x15e   : > { %p772_p13 = por %p771_p12, %p770_p11 }
 0x160   : > { %p773_p0 = pnand %p772_p13, %p766_p8 }
 0x162   : > { %776 = shalt.err (!%p773_p0)
}
 0x163   : > { %685 = dma.vmem_to_hbm [thread:$0]  (%p892_p5), %s538_s8, 128, %s934_s11, %s521_s12   ;;  %v467_v34 = vpop.permute.xlu1 %466  ;;  %v393_v39 = vsub.s32 0, %v919_v16  ;;  %v403_v40 = vsub.s32 1, %v919_v16  ;;  %v457_v47 = vpop.permute.xlu0 %456  ;;  %v414_v2 = vsub.s32 2, %v919_v16  ;;  %v425_v8 = vsub.s32 3, %v919_v16 }
 0x164   : > { %s660_s9 = sshll.u32 %s904_s30, 2  ;;  %s278_s8 = scalar_lea.vmem %s986_s4, %s907_s6 }
 0x165   : > { %s274_s14 = scalar_lea.vmem %s985_s3, %s660_s9 }
 0x166   : > { %v385_v32 = vld [vmem:[%s274_s14] sm:$0xf] }
 0x167   : > { %v437_v33 = vmul.f32 0.5, %v385_v32  ;;  %v478_v36 = vpop.permute.xlu1 %477  ;;  %v394_v0 = vrot.slane %v385_v32, %v393_v39  ;;  %v404_v1 = vrot.slane %v385_v32, %v403_v40  ;;  %v415_v7 = vrot.slane %v385_v32, %v414_v2 }
 0x168   : > { %v426_v13 = vrot.slane %v385_v32, %v425_v8 }
 0x169   : > { %v439_v35 = vrot.slane %v437_v33, 2 }
 0x16b   : > { %v441_v37 = vsub.f32 %v385_v32, %v439_v35  ;;  %v442_v38 = vadd.f32 %v439_v35, %v385_v32  ;;  %v487_v45 = vpop.permute.xlu1 %486 }
 0x16d   : > { %v449_v41 = vsub.f32 %v442_v38, %v441_v37  ;;  %v472_v42 = vrot.slane %v441_v37, %v393_v39  ;;  %v483_v43 = vrot.slane %v442_v38, %v403_v40  ;;  %v492_v44 = vrot.slane %v441_v37, %v403_v40 }
 0x16e   : > { %v462_v46 = vrot.slane %v442_v38, %v393_v39 }
 0x16f   : > { %v451_v48 = vrot.slane %v449_v41, 1  ;;  %v473_v49 = vmax.f32 %v467_v34, %v472_v42  ;;  %v484_v50 = vmin.f32 %v478_v36, %v483_v43  ;;  %v493_v51 = vmax.f32 %v487_v45, %v492_v44  ;;  %v389_v53 = vpop.permute.xlu1 %388 }
 0x170   : > { %v463_v52 = vmin.f32 %v457_v47, %v462_v46  ;;  %v395_v5 = vsub.f32 %v389_v53, %v394_v0 }
 0x171   : > { %v494_v54 = vsub.f32 %v484_v50, %v493_v51  ;;  %v453_v56 = vmul.f32 %v451_v48, %v449_v41 }
 0x172   : > { %v474_v55 = vsub.f32 %v463_v52, %v473_v49  ;;  %v396_v10 = vand.u32 2147483647, %v395_v5 }
 0x173   : > { %v495_v57 = vmax.f32 %v494_v54, 0.0  ;;  %v505_v59 = vrot.slane %v453_v56, %v393_v39 }
 0x174   : > { %v475_v58 = vmax.f32 %v474_v55, 0.0 }
 0x176   : > { %v496_v61 = vmul.f32 %v495_v57, %v475_v58 }
 0x188   : > { %v500_v60 = vpop.permute.xlu1 %499 }
 0x189   : > { %v506_v62 = vadd.f32 %v505_v59, %v500_v60 }
 0x18b   : > { %v507_v3 = vsub.f32 %v506_v62, %v496_v61 }
 0x18d   : > { %v399_v63 = vpop.permute.xlu1 %398  ;;  %v508_v9 = vadd.f32 1e-07, %v507_v3 }
 0x18e   : > { %v405_v6 = vsub.f32 %v399_v63, %v404_v1 }
 0x18f   : > { %747 = vrcp.f32 %v508_v9 }
 0x190   : > { %v406_v11 = vand.u32 2147483647, %v405_v6 }
 0x192   : > { %v410_v4 = vpop.permute.xlu1 %409  ;;  %v407_v15 = vadd.f32 %v406_v11, %v396_v10 }
 0x193   : > { %v416_v12 = vsub.f32 %v410_v4, %v415_v7 }
 0x195   : > { %v417_v17 = vand.u32 2147483647, %v416_v12 }
 0x197   : > { %v421_v14 = vpop.permute.xlu1 %420  ;;  %v418_v19 = vadd.f32 %v417_v17, %v407_v15 }
 0x198   : > { %v427_v18 = vsub.f32 %v421_v14, %v426_v13 }
 0x199   : > { %v748_v21 = vpop.eup %747 }
 0x19a   : > { %v428_v20 = vand.u32 2147483647, %v427_v18  ;;  %v510_v23 = vmul.f32 %v748_v21, %v496_v61 }
 0x19c   : > { %v429_v22 = vadd.f32 %v428_v20, %v418_v19  ;;  %v513_v28 = vmul.f32 2.0, %v510_v23 }
 0x19e   : > { %v511_v25 = vmul.f32 5.0, %v429_v22 }
 0x228   : > { %v379_v24 = vpop.f32.mrb[0].mxu0 }
 0x229   : > { %v383_v26 = vsub.f32 0.0, %v379_v24  ;;  %v681_v16 = vpop.f32.mrb[1].mxu0 }
 0x22b   : > { %v512_v27 = vadd.f32 %v511_v25, %v383_v26 }
 0x22d   : > { %v514_v29 = vsub.f32 %v512_v27, %v513_v28 }
 0x22f   : > { %515 = vst [vmem:[%s278_s8] sm:$0xff] %v514_v29 }
 0x230 PF: > { %p691_p5 = scmp.ge.s32.totalorder %s811_s21, 2  ;;  %s556_s11 = sand.u32 1, %s799_s18  }
 0x231   : > { %s557_s12 = scalar_lea.sflag [#allocation3], %s556_s11 }
 0x232   : > { %p688_p1 = pnand %p691_p5, %p896_p6 }
 0x234   : > { %794 = dma.done.wait (!%p688_p1), %s557_s12, 128  }
 0x235   : > { %796 = vsyncadd (!%p688_p1), %s557_s12, 4294967168  ;;  %p16_p2 = scmp.ge.s32.totalorder %s879_s24, 4   ;;  %s990_s18 = smov %s803_s19 }
 0x236   : > { %s991_s19 = smov %s807_s20  ;;  %s992_s20 = smov %s890_s27 }
 0x237   : > { %s993_s21 = smov %s879_s24  ;;  %18 = sbr.rel (!%p16_p2) target bundleno = 3 (0x3), region = 92 }
 0x23e   :  { %562 = vsyncpa [#allocation3], 1 }
 0x23f   :  { %564 = vsyncpa [#allocation3 + $0x1], 1 }

</bundles_post_ra>
